<compile_context>
chip_gen: v6e
topology: v6e:2x2x1
jax: 0.10.0
libtpu: 0.0.40
codegen_flags: <defaults>
</compile_context>

<pallas_src>
import functools

import jax
import jax.numpy as jnp
from jax import lax
from jax.experimental import pallas as pl
from jax.experimental.pallas import tpu as pltpu


_NEG_LARGE = -1.0e30  # finite "-inf" init for the running max (avoids NaN on empty cores)


def _round_up(x: int, m: int) -> int:
    return (x + m - 1) // m * m


def _num_tensorcores() -> int:
    """Best-effort TensorCores-per-device (v4 megacore / v5p / v7x -> 2, else 1)."""
    try:
        kind = jax.devices()[0].device_kind.lower()
    except Exception:
        return 1
    if ("v7" in kind) or ("v4" in kind) or ("v5p" in kind):
        return 2
    return 1


def _attention_kernel(q_ref, v_ref, m_out, l_out, acc_out,
                      m_ref, l_ref, acc_ref, *,
                      seq_len, block_s, inner_s, num_chunks,
                      tiles_per_core, masking_needed):
    # q_ref: [1, D]   v_ref: [block_s, D]
    # m_out/l_out: [1,1,1] f32   acc_out: [1,1,D] f32   (per-core partials)
    # m_ref/l_ref: [1,1] f32     acc_ref: [1,D] f32     (online-softmax state)
    c = pl.program_id(0)                    # core (parallel axis)
    s = pl.program_id(1)                    # sequence-tile step (reduction axis)
    last_s = pl.num_programs(1) - 1
    tile_id = c * tiles_per_core + s        # logical sequence tile
    base = tile_id * block_s                # first logical row of this tile

    @pl.when(s == 0)
    def _init():
        m_ref[...] = jnp.full_like(m_ref, _NEG_LARGE)
        l_ref[...] = jnp.zeros_like(l_ref)
        acc_ref[...] = jnp.zeros_like(acc_ref)

    q = q_ref[...]                          # native dtype, no eager f32 cast

    def online_update(v, scores):
        m_prev = m_ref[...]                                              # [1,1]
        m_new = jnp.maximum(m_prev, jnp.max(scores, axis=1, keepdims=True))
        alpha = jnp.exp(m_prev - m_new)                                  # [1,1]
        p = jnp.exp(scores - m_new)                                      # [1,inner_s]
        l_ref[...] = alpha * l_ref[...] + jnp.sum(p, axis=1, keepdims=True)
        acc_ref[...] = alpha * acc_ref[...] + lax.dot_general(
            p.astype(v.dtype), v, (((1,), (0,)), ((), ())),
            preferred_element_type=jnp.float32)
        m_ref[...] = m_new

    def do_chunk(ci, masked):
        if num_chunks == 1:
            v = v_ref[...]
        else:
            start = pl.multiple_of(ci * inner_s, inner_s)
            v = v_ref[pl.ds(start, inner_s), :]
        # Lane-dense scores: contract over D -> [1, inner_s], f32 accumulation.
        scores = lax.dot_general(
            q, v, (((1,), (1,)), ((), ())), preferred_element_type=jnp.float32)
        if masked:
            chunk_base = base + ci * inner_s
            col = lax.broadcasted_iota(jnp.int32, (1, inner_s), 1)
            scores = jnp.where(chunk_base + col < seq_len, scores, -jnp.inf)
            # Zero invalid rows of v so undefined tail-buffer data cannot
            # produce NaN/Inf in the second matmul (p is exactly 0 there).
            rows = lax.broadcasted_iota(jnp.int32, (inner_s, 1), 0)
            v = jnp.where(chunk_base + rows < seq_len, v, jnp.zeros_like(v))
        online_update(v, scores)

    def run_tile(masked):
        if num_chunks == 1:
            do_chunk(0, masked)
        else:
            @pl.loop(0, num_chunks)
            def _(ci):
                do_chunk(ci, masked)

    if not masking_needed:
        run_tile(masked=False)
    else:
        is_full = (base + block_s) <= seq_len

        @pl.when(is_full)
        def _full_tile():
            run_tile(masked=False)

        @pl.when(jnp.logical_not(is_full))
        def _tail_tile():
            run_tile(masked=True)

    @pl.when(s == last_s)
    def _finalize():
        m_out[...] = m_ref[...].reshape(m_out.shape)
        l_out[...] = l_ref[...].reshape(l_out.shape)
        acc_out[...] = acc_ref[...].reshape(acc_out.shape)


def attention(query: jax.Array, values: jax.Array, *,
              block_s: int | None = None, num_cores: int | None = None
              ) -> jax.Array:
    """query: [D] (decoder_dim), values: [S, D] (seq, encoder_dim) -> [D]."""
    assert query.ndim == 1 and values.ndim == 2
    D = query.shape[0]
    S, E = values.shape
    assert E == D, "dot-product scoring requires encoder_dim == decoder_dim"
    dtype = values.dtype
    itemsize = jnp.dtype(dtype).itemsize

    # ---- Generation-aware VMEM budget, lane-padded byte accounting. ----
    try:
        vmem_cap = int(pltpu.get_tpu_info().vmem_capacity_bytes)
    except Exception:
        vmem_cap = 64 * 1024 * 1024          # conservative (v7x per-core)
    # per-tile budget: ~32 MiB on 128-MiB parts (v5e/v6e), ~20 MiB on 64-MiB v7x.
    per_tile_budget = min(32 << 20, max(4 << 20, vmem_cap // 2 - (12 << 20)))
    bytes_per_row = max(D, 128) * itemsize   # lanes pad to 128

    if block_s is None:
        block_s = per_tile_budget // bytes_per_row
        block_s = max(8, min(32768, (block_s // 8) * 8))
    block_s = max(8, _round_up(min(block_s, _round_up(S, 8)), 8))

    # Inner sub-chunking bounds the vreg working set of the [1, block_s] scores.
    inner_s = min(block_s, 2048)
    if block_s > inner_s:
        block_s = (block_s // inner_s) * inner_s
    num_chunks = block_s // inner_s

    num_tiles = pl.cdiv(S, block_s)
    if num_cores is None:
        num_cores = _num_tensorcores()
    num_cores = max(1, min(int(num_cores), num_tiles))
    tiles_per_core = pl.cdiv(num_tiles, num_cores)
    # Masking is needed iff any logical tile (incl. per-core dummies) crosses S.
    masking_needed = (num_cores * tiles_per_core * block_s) != S

    q2 = query.reshape(1, D)

    def values_index_map(c, s):
        t = c * tiles_per_core + s
        # Clamp dummy steps to the last real block (their rows are fully masked).
        return (jnp.minimum(t, num_tiles - 1), 0)

    kernel = functools.partial(
        _attention_kernel, seq_len=S, block_s=block_s, inner_s=inner_s,
        num_chunks=num_chunks, tiles_per_core=tiles_per_core,
        masking_needed=masking_needed)

    tile_bytes = block_s * bytes_per_row
    vmem_limit = int(min(vmem_cap, max(32 << 20, 2 * tile_bytes + (16 << 20))))

    m_p, l_p, acc_p = pl.pallas_call(
        kernel,
        out_shape=(
            jax.ShapeDtypeStruct((num_cores, 1, 1), jnp.float32),   # running max m
            jax.ShapeDtypeStruct((num_cores, 1, 1), jnp.float32),   # running denom l
            jax.ShapeDtypeStruct((num_cores, 1, D), jnp.float32),   # unnormalized sum
        ),
        grid_spec=pltpu.PrefetchScalarGridSpec(
            num_scalar_prefetch=0,
            grid=(num_cores, tiles_per_core),
            in_specs=[
                pl.BlockSpec((1, D), lambda c, s: (0, 0)),           # query
                pl.BlockSpec((block_s, D), values_index_map),        # values tiles
            ],
            out_specs=[
                pl.BlockSpec((1, 1, 1), lambda c, s: (c, 0, 0)),
                pl.BlockSpec((1, 1, 1), lambda c, s: (c, 0, 0)),
                pl.BlockSpec((1, 1, D), lambda c, s: (c, 0, 0)),
            ],
            scratch_shapes=[
                pltpu.VMEM((1, 1), jnp.float32),   # running max m
                pltpu.VMEM((1, 1), jnp.float32),   # running denom l
                pltpu.VMEM((1, D), jnp.float32),   # running weighted sum
            ],
        ),
        compiler_params=pltpu.CompilerParams(
            dimension_semantics=("parallel", "arbitrary"),
            vmem_limit_bytes=vmem_limit,
        ),
    )(q2, values)

    # Merge per-core partial online-softmax states (exact log-sum-exp combine).
    m_v = m_p[:, 0, 0]           # [C]
    l_v = l_p[:, 0, 0]           # [C]
    a_v = acc_p[:, 0, :]         # [C, D]
    m_tot = jnp.max(m_v)
    w = jnp.exp(m_v - m_tot)     # [C]; cores with no valid rows get w == 0
    denom = jnp.sum(w * l_v)
    out = jnp.sum(w[:, None] * a_v, axis=0) / denom   # exact divide
    return out.astype(dtype)


def _reference(query, values):
    hp = lax.Precision.HIGHEST
    v32 = values.astype(jnp.float32)
    scores = jnp.matmul(v32, query.astype(jnp.float32), precision=hp)   # [S]
    w = jax.nn.softmax(scores, axis=0)                                  # [S]
    return jnp.matmul(w, v32, precision=hp)                             # [D]


if __name__ == "__main__":
    key = jax.random.PRNGKey(0)
    k1, k2, k3, k4, k5, k6 = jax.random.split(key, 6)

    # Test 1: module-consistent small shapes (encoder_dim=decoder_dim=32, seq=8).
    D0, S0 = 32, 8
    q0 = jax.random.normal(k1, (D0,), dtype=jnp.float32)
    v0 = jax.random.normal(k2, (S0, D0), dtype=jnp.float32)
    o0 = attention(q0, v0)
    jax.block_until_ready(o0)
    r0 = _reference(q0, v0)
    assert o0.shape == (D0,)
    assert jnp.allclose(o0, r0, atol=1e-3, rtol=1e-3), (o0, r0)

    # Test 2: multi-tile + ragged tail + forced 2-core split (exercises the
    # per-core partials and the log-sum-exp combine even on 1-TC chips).
    D1, S1 = 128, 200
    q1 = jax.random.normal(k3, (D1,), dtype=jnp.float32)
    v1 = jax.random.normal(k4, (S1, D1), dtype=jnp.float32)
    o1 = attention(q1, v1, block_s=64, num_cores=2)
    jax.block_until_ready(o1)
    r1 = _reference(q1, v1)
    assert o1.shape == (D1,)
    assert jnp.allclose(o1, r1, atol=1e-3, rtol=1e-3), (o1, r1)

    # Test 3: auto-sized tile with inner sub-chunking + tail masking.
    D2, S2 = 32, 4100
    q2 = jax.random.normal(k5, (D2,), dtype=jnp.float32)
    v2 = jax.random.normal(k6, (S2, D2), dtype=jnp.float32)
    o2 = attention(q2, v2)
    jax.block_until_ready(o2)
    r2 = _reference(q2, v2)
    assert o2.shape == (D2,)
    assert jnp.allclose(o2, r2, atol=1e-3, rtol=1e-3), (o2, r2)

    print("KERNEL_OK")
</pallas_src>

<mosaic_0001>
module attributes {stable_mosaic.version = 11 : i64} {
  func.func @_attention_kernel(%arg0: i32, %arg1: i32, %arg2: memref<1x32xf32, #tpu.memory_space<vmem>>, %arg3: memref<8x32xf32, #tpu.memory_space<vmem>>, %arg4: memref<1x1x1xf32, #tpu.memory_space<vmem>>, %arg5: memref<1x1x1xf32, #tpu.memory_space<vmem>>, %arg6: memref<1x1x32xf32, #tpu.memory_space<vmem>>, %arg7: memref<1x1xf32, #tpu.memory_space<vmem>>, %arg8: memref<1x1xf32, #tpu.memory_space<vmem>>, %arg9: memref<1x32xf32, #tpu.memory_space<vmem>>) attributes {dimension_semantics = [#tpu.dimension_semantics<parallel>, #tpu.dimension_semantics<arbitrary>], iteration_bounds = array<i64: 1, 1>, scalar_prefetch = 0 : i64, scratch_operands = 3 : i64, tpu.core_type = #tpu.core_type<tc>, window_params = [{pipeline_mode = #tpu.pipeline_mode<synchronous>, transform_indices = @transform_0, window_bounds = array<i64: 1, 32>}, {transform_indices = @transform_1, window_bounds = array<i64: 8, 32>}, {transform_indices = @transform_2, window_bounds = array<i64: 1, 1, 1>}, {transform_indices = @transform_3, window_bounds = array<i64: 1, 1, 1>}, {transform_indices = @transform_4, window_bounds = array<i64: 1, 1, 32>}]} {
    %c0_i32 = arith.constant 0 : i32
    %0 = arith.cmpi eq, %arg1, %c0_i32 : i32
    %1 = arith.extui %0 : i1 to i32
    %c0_i32_0 = arith.constant 0 : i32
    %2 = arith.cmpi ne, %1, %c0_i32_0 : i32
    scf.if %2 {
      %cst_21 = arith.constant -1.000000e+30 : f32
      %31 = vector.broadcast %cst_21 : f32 to vector<1x1xf32>
      %c0_22 = arith.constant 0 : index
      %c0_23 = arith.constant 0 : index
      %32 = vector.load %arg7[%c0_22, %c0_23] : memref<1x1xf32, #tpu.memory_space<vmem>>, vector<1x1xf32>
      tpu.vector_store %arg7[%c0_22, %c0_23], %31 {strides = array<i32>} : memref<1x1xf32, #tpu.memory_space<vmem>>, vector<1x1xf32>,
      %cst_24 = arith.constant 0.000000e+00 : f32
      %33 = vector.broadcast %cst_24 : f32 to vector<1x1xf32>
      %c0_25 = arith.constant 0 : index
      %c0_26 = arith.constant 0 : index
      %34 = vector.load %arg8[%c0_25, %c0_26] : memref<1x1xf32, #tpu.memory_space<vmem>>, vector<1x1xf32>
      tpu.vector_store %arg8[%c0_25, %c0_26], %33 {strides = array<i32>} : memref<1x1xf32, #tpu.memory_space<vmem>>, vector<1x1xf32>,
      %cst_27 = arith.constant 0.000000e+00 : f32
      %35 = vector.broadcast %cst_27 : f32 to vector<1x32xf32>
      %c0_28 = arith.constant 0 : index
      %c0_29 = arith.constant 0 : index
      %36 = vector.load %arg9[%c0_28, %c0_29] : memref<1x32xf32, #tpu.memory_space<vmem>>, vector<1x32xf32>
      tpu.vector_store %arg9[%c0_28, %c0_29], %35 {strides = array<i32>} : memref<1x32xf32, #tpu.memory_space<vmem>>, vector<1x32xf32>,
    } else {
    }
    %c0 = arith.constant 0 : index
    %c0_1 = arith.constant 0 : index
    %3 = vector.load %arg2[%c0, %c0_1] : memref<1x32xf32, #tpu.memory_space<vmem>>, vector<1x32xf32>
    %c0_2 = arith.constant 0 : index
    %c0_3 = arith.constant 0 : index
    %4 = vector.load %arg3[%c0_2, %c0_3] : memref<8x32xf32, #tpu.memory_space<vmem>>, vector<8x32xf32>
    %cst = arith.constant dense<0.000000e+00> : vector<1x8xf32>
    %5 = tpu.matmul %3, %4, %cst {dimension_numbers = #tpu.dot_dimension_numbers<[1], [1], [0], [0], [0, 0, 1, 0], [], []>} : vector<1x32xf32>, vector<8x32xf32>, vector<1x8xf32> -> vector<1x8xf32>
    %c0_4 = arith.constant 0 : index
    %c0_5 = arith.constant 0 : index
    %6 = vector.load %arg7[%c0_4, %c0_5] : memref<1x1xf32, #tpu.memory_space<vmem>>, vector<1x1xf32>
    %cst_6 = arith.constant dense<0xFF800000> : vector<1xf32>
    %7 = vector.multi_reduction <maximumf>, %5, %cst_6 [1] : vector<1x8xf32> to vector<1xf32>
    %8 = vector.shape_cast %7 : vector<1xf32> to vector<1x1xf32>
    %9 = arith.maximumf %6, %8 : vector<1x1xf32>
    %10 = arith.subf %6, %9 : vector<1x1xf32>
    %11 = math.exp %10 : vector<1x1xf32>
    %12 = vector.broadcast %9 : vector<1x1xf32> to vector<1x8xf32>
    %13 = arith.subf %5, %12 : vector<1x8xf32>
    %14 = math.exp %13 : vector<1x8xf32>
    %c0_7 = arith.constant 0 : index
    %c0_8 = arith.constant 0 : index
    %15 = vector.load %arg8[%c0_7, %c0_8] : memref<1x1xf32, #tpu.memory_space<vmem>>, vector<1x1xf32>
    %16 = arith.mulf %11, %15 : vector<1x1xf32>
    %cst_9 = arith.constant dense<0.000000e+00> : vector<1xf32>
    %17 = vector.multi_reduction <add>, %14, %cst_9 [1] : vector<1x8xf32> to vector<1xf32>
    %18 = vector.shape_cast %17 : vector<1xf32> to vector<1x1xf32>
    %19 = arith.addf %16, %18 : vector<1x1xf32>
    %c0_10 = arith.constant 0 : index
    %c0_11 = arith.constant 0 : index
    %20 = vector.load %arg8[%c0_10, %c0_11] : memref<1x1xf32, #tpu.memory_space<vmem>>, vector<1x1xf32>
    tpu.vector_store %arg8[%c0_10, %c0_11], %19 {strides = array<i32>} : memref<1x1xf32, #tpu.memory_space<vmem>>, vector<1x1xf32>,
    %c0_12 = arith.constant 0 : index
    %c0_13 = arith.constant 0 : index
    %21 = vector.load %arg9[%c0_12, %c0_13] : memref<1x32xf32, #tpu.memory_space<vmem>>, vector<1x32xf32>
    %22 = vector.broadcast %11 : vector<1x1xf32> to vector<1x32xf32>
    %23 = arith.mulf %22, %21 : vector<1x32xf32>
    %cst_14 = arith.constant dense<0.000000e+00> : vector<1x32xf32>
    %24 = tpu.matmul %14, %4, %cst_14 {dimension_numbers = #tpu.dot_dimension_numbers<[1], [0], [0], [1], [0, 0, 1, 1], [], []>} : vector<1x8xf32>, vector<8x32xf32>, vector<1x32xf32> -> vector<1x32xf32>
    %25 = arith.addf %23, %24 : vector<1x32xf32>
    %c0_15 = arith.constant 0 : index
    %c0_16 = arith.constant 0 : index
    %26 = vector.load %arg9[%c0_15, %c0_16] : memref<1x32xf32, #tpu.memory_space<vmem>>, vector<1x32xf32>
    tpu.vector_store %arg9[%c0_15, %c0_16], %25 {strides = array<i32>} : memref<1x32xf32, #tpu.memory_space<vmem>>, vector<1x32xf32>,
    %c0_17 = arith.constant 0 : index
    %c0_18 = arith.constant 0 : index
    %27 = vector.load %arg7[%c0_17, %c0_18] : memref<1x1xf32, #tpu.memory_space<vmem>>, vector<1x1xf32>
    tpu.vector_store %arg7[%c0_17, %c0_18], %9 {strides = array<i32>} : memref<1x1xf32, #tpu.memory_space<vmem>>, vector<1x1xf32>,
    %c0_i32_19 = arith.constant 0 : i32
    %28 = arith.cmpi eq, %arg1, %c0_i32_19 : i32
    %29 = arith.extui %28 : i1 to i32
    %c0_i32_20 = arith.constant 0 : i32
    %30 = arith.cmpi ne, %29, %c0_i32_20 : i32
    scf.if %30 {
      %c0_21 = arith.constant 0 : index
      %c0_22 = arith.constant 0 : index
      %31 = vector.load %arg7[%c0_21, %c0_22] : memref<1x1xf32, #tpu.memory_space<vmem>>, vector<1x1xf32>
      %32 = vector.shape_cast %31 : vector<1x1xf32> to vector<1x1x1xf32>
      %c0_23 = arith.constant 0 : index
      %c0_24 = arith.constant 0 : index
      %c0_25 = arith.constant 0 : index
      %33 = vector.load %arg4[%c0_23, %c0_24, %c0_25] : memref<1x1x1xf32, #tpu.memory_space<vmem>>, vector<1x1x1xf32>
      tpu.vector_store %arg4[%c0_23, %c0_24, %c0_25], %32 {strides = array<i32>} : memref<1x1x1xf32, #tpu.memory_space<vmem>>, vector<1x1x1xf32>,
      %c0_26 = arith.constant 0 : index
      %c0_27 = arith.constant 0 : index
      %34 = vector.load %arg8[%c0_26, %c0_27] : memref<1x1xf32, #tpu.memory_space<vmem>>, vector<1x1xf32>
      %35 = vector.shape_cast %34 : vector<1x1xf32> to vector<1x1x1xf32>
      %c0_28 = arith.constant 0 : index
      %c0_29 = arith.constant 0 : index
      %c0_30 = arith.constant 0 : index
      %36 = vector.load %arg5[%c0_28, %c0_29, %c0_30] : memref<1x1x1xf32, #tpu.memory_space<vmem>>, vector<1x1x1xf32>
      tpu.vector_store %arg5[%c0_28, %c0_29, %c0_30], %35 {strides = array<i32>} : memref<1x1x1xf32, #tpu.memory_space<vmem>>, vector<1x1x1xf32>,
      %c0_31 = arith.constant 0 : index
      %c0_32 = arith.constant 0 : index
      %37 = vector.load %arg9[%c0_31, %c0_32] : memref<1x32xf32, #tpu.memory_space<vmem>>, vector<1x32xf32>
      %38 = vector.shape_cast %37 : vector<1x32xf32> to vector<1x1x32xf32>
      %c0_33 = arith.constant 0 : index
      %c0_34 = arith.constant 0 : index
      %c0_35 = arith.constant 0 : index
      %39 = vector.load %arg6[%c0_33, %c0_34, %c0_35] : memref<1x1x32xf32, #tpu.memory_space<vmem>>, vector<1x1x32xf32>
      tpu.vector_store %arg6[%c0_33, %c0_34, %c0_35], %38 {strides = array<i32>} : memref<1x1x32xf32, #tpu.memory_space<vmem>>, vector<1x1x32xf32>,
    } else {
    }
    return
  }
  func.func @transform_0(%arg0: i32, %arg1: i32) -> (i32, i32) {
    %c0_i32 = arith.constant 0 : i32
    %c0_i32_0 = arith.constant 0 : i32
    %c0_i32_1 = arith.constant 0 : i32
    return %c0_i32, %c0_i32_0 : i32, i32
  }
  func.func @transform_1(%arg0: i32, %arg1: i32) -> (i32, i32) {
    %c1_i32 = arith.constant 1 : i32
    %0 = arith.muli %arg0, %c1_i32 : i32
    %1 = arith.addi %0, %arg1 : i32
    %c0_i32 = arith.constant 0 : i32
    %2 = arith.minsi %1, %c0_i32 : i32
    %c0_i32_0 = arith.constant 0 : i32
    %c0_i32_1 = arith.constant 0 : i32
    return %2, %c0_i32_0 : i32, i32
  }
  func.func @transform_2(%arg0: i32, %arg1: i32) -> (i32, i32, i32) {
    %c0_i32 = arith.constant 0 : i32
    %c0_i32_0 = arith.constant 0 : i32
    %c0_i32_1 = arith.constant 0 : i32
    return %arg0, %c0_i32, %c0_i32_0 : i32, i32, i32
  }
  func.func @transform_3(%arg0: i32, %arg1: i32) -> (i32, i32, i32) {
    %c0_i32 = arith.constant 0 : i32
    %c0_i32_0 = arith.constant 0 : i32
    %c0_i32_1 = arith.constant 0 : i32
    return %arg0, %c0_i32, %c0_i32_0 : i32, i32, i32
  }
  func.func @transform_4(%arg0: i32, %arg1: i32) -> (i32, i32, i32) {
    %c0_i32 = arith.constant 0 : i32
    %c0_i32_0 = arith.constant 0 : i32
    %c0_i32_1 = arith.constant 0 : i32
    return %arg0, %c0_i32, %c0_i32_0 : i32, i32, i32
  }
}

</mosaic_0001>

<bundles_post_ra>
// kernel: tpu_custom_call.1
= control target key start
LH: loop header
LB: loop body
LE: loop exit
PB: predicated region body
PF: predicated region fallthrough
CT: control target
= control target key end

     0   :  { %10 = vsyncpa [#allocation6], 0  ;;  %s508_s0 = inlined_call_operand.hbm [shape: f32[1,32], index: 0, kind: input, shape index: {}]   ;;  %s509_s1 = inlined_call_operand.hbm [shape: f32[8,32], index: 1, kind: input, shape index: {}]   ;;  %s510_s2 = inlined_call_operand.hbm [shape: f32[1,1,1], index: 2, kind: output, shape index: {0}]   ;;  %s511_s3 = inlined_call_operand.hbm [shape: f32[1,1,1], index: 3, kind: output, shape index: {1}]   ;;  %s512_s4 = inlined_call_operand.hbm [shape: f32[1,1,32], index: 4, kind: output, shape index: {2}]  }
   0x1   :  { %11 = vsyncpa [#allocation9], 0 }
   0x2   :  { %12 = vsyncpa [#allocation7], 0 }
   0x3   :  { %13 = vsyncpa [#allocation12], 0  ;;  %s448_s15 = smov [#allocation5]   ;;  %s449_s17 = smov [#allocation8]  }
   0x4   :  { %s20_s16 = sshll.u32 %s448_s15, 4  ;;  %s35_s18 = sshll.u32 %s449_s17, 4  ;;  %s21_s16 = int_to_ptr.vmem [resolvable:$true] %s20_s16  ;;  %s36_s18 = int_to_ptr.vmem [resolvable:$true] %s35_s18 }
   0x5   :  { %s348_s19 = scalar_lea.vmem %s21_s16, 16  ;;  %s352_s20 = scalar_lea.vmem %s21_s16, 32 }
   0x6   :  { %p349_p0 = scmp.ne.s32.totalorder %s21_s16, %s348_s19  ;;  %p353_p1 = scmp.lt.s32.totalorder %s21_s16, %s21_s16 }
   0x7   :  { %p354_p2 = scmp.lt.s32.totalorder %s352_s20, %s348_s19 }
   0x9   :  { %p355_p3 = por %p354_p2, %p353_p1 }
   0xb   :  { %p356_p4 = pnand %p355_p3, %p349_p0 }
   0xd   :  { %359 = shalt.err (!%p356_p4)
}
   0xe   :  { %23 = dma.hbm_to_vmem [thread:$0]  %s508_s0, 16, %s21_s16, [#allocation6]  }
   0xf   :  { %s368_s23 = scalar_lea.vmem %s36_s18, 128  ;;  %p373_p6 = scmp.lt.s32.totalorder %s36_s18, %s36_s18 }
  0x10   :  { %p369_p5 = scmp.ne.s32.totalorder %s36_s18, %s368_s23  ;;  %p374_p7 = scmp.lt.s32.totalorder %s368_s23, %s368_s23 }
  0x12   :  { %p375_p8 = por %p374_p7, %p373_p6 }
  0x14   :  { %p376_p9 = pnand %p375_p8, %p369_p5 }
  0x16   :  { %379 = shalt.err (!%p376_p9)
}
  0x17   :  { %38 = dma.hbm_to_vmem [thread:$0]  %s509_s1, 128, %s36_s18, [#allocation9]  }
  0x18   :  { %440 = dma.done.wait [#allocation6], 16  }
  0x19   :  { %441 = vsyncadd [#allocation6], 4294967280 }
  0x1a   :  { %442 = dma.done.wait [#allocation9], 128  }
  0x1b   :  { %443 = vsyncadd [#allocation9], 4294967168  ;;  %v450_v0 = vmov 0.0   ;;  %vm451_vm0 = vmmov 0   ;;  %vm59_vm1 = vcmask 261120   ;;  %v58_v1 = vld [vmem:[#allocation8] sm:$0xff]  ;;  %v150_v13 = vlaneseq }
  0x1c   :  { %315 = vmatprep.subr.mxu0 %v450_v0  ;;  %317 = vmatprep.mubr.msk.f32.mxu0 %vm451_vm0, %v450_v0  ;;  %v57_v2 = vld [vmem:[#allocation5] sm:$0x1]  ;;  %vm52_vm2 = vcmask 0   ;;  %v452_v3 = vmov -1e+30   ;;  %vm137_vm3 = vcmask 57344  }
  0x1d   :  { %320 = vmatprep.subr.mxu1 %v450_v0  ;;  %322 = vmatprep.mubr.msk.f32.mxu1 %vm451_vm0, %v450_v0  ;;  %53 = vst.msk [vmem:[#allocation2] sm:$0x1] %vm52_vm2, %v452_v3  ;;  %54 = vst.msk [vmem:[#allocation3] sm:$0x1] %vm52_vm2, %v450_v0  ;;  %v453_v7 = vmov 0   ;;  %v151_v14 = vshrl.u32 %v150_v13, 7 }
  0x1e   :  { %316 = vmatpush3.xpose.msk.msra.mxu0 %vm59_vm1, %v58_v1  ;;  %321 = vmatpush3.msra.mxu1 %v58_v1  ;;  %vm176_vm4 = vcmask 64512   ;;  %vm55_vm5 = vcmask 253952   ;;  %s454_s0 = smov [#allocation10]  }
  0x1f   :  { %334 = vset.pattern.permute.xlu0 %v453_v7  ;;  %335 = vset.pattern.permute.xlu1 %v453_v7  ;;  %v152_v15 = vsub.s32 0, %v151_v14  ;;  %56 = vst.msk [vmem:[#allocation4] sm:$0x1] %vm55_vm5, %v450_v0  ;;  %s269_s1 = sshll.u32 %s454_s0, 4  ;;  %s270_s1 = int_to_ptr.vmem [resolvable:$true] %s269_s1 }
  0x20   :  { %s380_s26 = scalar_lea.vmem %s270_s1, 16  ;;  %s384_s27 = scalar_lea.vmem %s270_s1, 32 }
  0x21   :  { %318 = vmatmul.mubr.msk.f32.vlgmr.msra.gmra.mxu0 %vm59_vm1, %v57_v2  ;;  %p381_p10 = scmp.ne.s32.totalorder %s270_s1, %s380_s26  ;;  %p385_p11 = scmp.lt.s32.totalorder %s270_s1, %s270_s1 }
  0x22   :  { %p386_p12 = scmp.lt.s32.totalorder %s384_s27, %s380_s26 }
  0x24   :  { %v136_v8 = vld [vmem:[#allocation2] sm:$0x1]  ;;  %p387_p13 = por %p386_p12, %p385_p11 }
  0x26   :  { %p388_p0 = pnand %p387_p13, %p381_p10 }
  0xe1   :  { %v132_v4 = vpop.f32.mrf.mxu0 }
  0xe2   :  { %v138_v5 = vsel %vm137_vm3, %v132_v4, -inf }
  0xe3   :  { %139 = vmax.xlane.f32.xlu0 %v138_v5  ;;  %v319_v6 = vpop.f32.mrf.mxu0 }
 0x16c   :  { %v140_v9 = vpop.xlane.xlu0 %139 }
 0x16d   :  { %v141_v10 = vmax.f32 %v136_v8, %v140_v9 }
 0x16f   :  { %v142_v11 = vsub.f32 %v136_v8, %v141_v10  ;;  %253 = vst.msk [vmem:[#allocation2] sm:$0x1] %vm52_vm2, %v141_v10  ;;  %147 = vperm.xlu0 %334, %v141_v10  }
 0x171   :  { %v143_v21 = vmul.f32 1.442695, %v142_v11 }
 0x176   :  { %v257_v12 = vld [vmem:[#allocation2] sm:$0x1] }
 0x177   :  { %258 = vst.msk [vmem:[#allocation10] sm:$0x1] %vm52_vm2, %v257_v12 }
 0x1ea   :  { %v148_v16 = vpop.permute.xlu0 %147 }
 0x1eb   :  { %v153_v17 = vrot.slane %v148_v16, %v152_v15 }
 0x1ed   :  { %v154_v18 = vsub.f32 %v132_v4, %v153_v17 }
 0x1ef   :  { %v155_v19 = vmul.f32 1.442695, %v154_v18 }
 0x1f1   :  { %336 = vpow2.f32 %v155_v19 }
 0x1f2   :  { %338 = vpow2.f32 %v143_v21 }
 0x1fe   :  { %v337_v20 = vpop.eup %336 }
 0x1ff   :  { %323 = vmatmul.mubr.msk.f32.vlgmr.msra.gmra.mxu1 %vm176_vm4, %v337_v20  ;;  %v159_v22 = vsel %vm137_vm3, %v337_v20, 0.0  ;;  %v339_v23 = vpop.eup %338 }
 0x200   :  { %160 = vadd.xlane.f32.xlu1 %v159_v22 }
 0x211   :  { %168 = vperm.xlu1 %335, %v339_v23  }
 0x212   :  { %391 = shalt.err (!%p388_p0)
}
 0x213   :  { %272 = dma.vmem_to_hbm [thread:$0]  %s270_s1, 16, %s510_s2, [#allocation7]   ;;  %v157_v24 = vld [vmem:[#allocation3] sm:$0x1] }
 0x214   :  { %v158_v25 = vmul.f32 %v339_v23, %v157_v24  ;;  %s455_s30 = smov [#allocation11]  }
 0x215   :  { %s279_s5 = sshll.u32 %s455_s30, 4  ;;  %s280_s5 = int_to_ptr.vmem [resolvable:$true] %s279_s5 }
 0x216   :  { %s400_s6 = scalar_lea.vmem %s280_s5, 16  ;;  %s404_s7 = scalar_lea.vmem %s280_s5, 32 }
 0x217   :  { %p401_p1 = scmp.ne.s32.totalorder %s280_s5, %s400_s6  ;;  %p405_p2 = scmp.lt.s32.totalorder %s280_s5, %s280_s5 }
 0x218   :  { %p406_p3 = scmp.lt.s32.totalorder %s404_s7, %s400_s6 }
 0x21a   :  { %p407_p4 = por %p406_p3, %p405_p2 }
 0x21c   :  { %p408_p5 = pnand %p407_p4, %p401_p1 }
 0x289   :  { %v161_v26 = vpop.xlane.xlu1 %160 }
 0x28a   :  { %v162_v27 = vadd.f32 %v161_v26, %v158_v25 }
 0x28c   :  { %164 = vst.msk [vmem:[#allocation3] sm:$0x1] %vm52_vm2, %v162_v27 }
 0x293   :  { %v259_v28 = vld [vmem:[#allocation3] sm:$0x1] }
 0x294   :  { %260 = vst.msk [vmem:[#allocation11] sm:$0x1] %vm52_vm2, %v259_v28 }
 0x295   :  { %411 = shalt.err (!%p408_p5)
}
 0x296   :  { %282 = dma.vmem_to_hbm [thread:$0]  %s280_s5, 16, %s511_s3, [#allocation12]   ;;  %v169_v29 = vpop.permute.xlu1 %168  ;;  %v165_v31 = vld [vmem:[#allocation4] sm:$0x1] }
 0x297   :  { %v174_v30 = vrot.slane %v169_v29, %v152_v15  ;;  %s456_s9 = smov [#allocation13]  }
 0x298   :  { %s289_s10 = sshll.u32 %s456_s9, 4  ;;  %s290_s10 = int_to_ptr.vmem [resolvable:$true] %s289_s10 }
 0x299   :  { %v175_v32 = vmul.f32 %v174_v30, %v165_v31  ;;  %s420_s11 = scalar_lea.vmem %s290_s10, 16  ;;  %s424_s12 = scalar_lea.vmem %s290_s10, 32 }
 0x29a   :  { %p421_p6 = scmp.ne.s32.totalorder %s290_s10, %s420_s11  ;;  %p425_p7 = scmp.lt.s32.totalorder %s290_s10, %s290_s10 }
 0x29b   :  { %p426_p8 = scmp.lt.s32.totalorder %s424_s12, %s420_s11 }
 0x29d   :  { %p427_p9 = por %p426_p8, %p425_p7 }
 0x29f   :  { %p428_p10 = pnand %p427_p9, %p421_p6 }
 0x2bf   :  { %v246_v33 = vpop.f32.mrf.mxu1 }
 0x2c0   :  { %v250_v34 = vadd.f32 %v246_v33, %v175_v32 }
 0x2c1   :  { %v324_v35 = vpop.f32.mrf.mxu1 }
 0x2c2   :  { %252 = vst.msk [vmem:[#allocation4] sm:$0x1] %vm55_vm5, %v250_v34 }
 0x2c9   :  { %v261_v36 = vld [vmem:[#allocation4] sm:$0x1] }
 0x2ca   :  { %262 = vst.msk [vmem:[#allocation13] sm:$0x1] %vm55_vm5, %v261_v36 }
 0x2cb   :  { %431 = shalt.err (!%p428_p10)
}
 0x2cc   :  { %292 = dma.vmem_to_hbm [thread:$0]  %s290_s10, 16, %s512_s4, [#allocation12]  }
 0x2cd   :  { %444 = dma.done.wait [#allocation7], 16  }
 0x2ce   :  { %445 = vsyncadd [#allocation7], 4294967280 }
 0x2cf   :  { %446 = dma.done.wait [#allocation12], 32  }
 0x2d0   :  { %447 = vsyncadd [#allocation12], 4294967264 }
 0x2d1   :  { %302 = vsyncpa [#allocation6], 1 }
 0x2d2   :  { %303 = vsyncpa [#allocation9], 1 }
 0x2d3   :  { %304 = vsyncpa [#allocation7], 1 }
 0x2d4   :  { %305 = vsyncpa [#allocation12], 1 }

</bundles_post_ra>
